<compile_context>
chip_gen: v6e
topology: v6e:2x2x1
jax: 0.10.0
libtpu: 0.0.40
codegen_flags: <defaults>
</compile_context>

<pallas_src>
import functools

import jax
import jax.numpy as jnp
from jax.experimental import pallas as pl
from jax.experimental.pallas import tpu as pltpu

IN_F = 5    # input features
HID_F = 10  # hidden features
OUT_F = 5   # output features

# Largest batch tile (rows per grid step).  Row-major (tile_b, 5) f32 blocks
# occupy 512 B/row of VMEM (lane-padded); x + out, double-buffered:
# 2048 * tile_b bytes -> 32 MiB at 16384, which fits under the computed
# vmem_limit on every generation (v7x has 64 MiB/TC physical).
_MAX_TILE_B = 16384
# Above this batch size, force at least 2 grid steps so the "parallel" axis
# can be sharded across v7x's two TensorCores.
_MIN_SPLIT_B = 4096


def _round_up(x, m):
    return ((x + m - 1) // m) * m


def _mlp_kernel(x_ref, w1t_ref, b1_ref, w2t_ref, b2_ref, o_ref):
    # Row-major blocks:
    #   x:(tile_b, 5)  w1t:(5, 10)  b1:(1, 10)  w2t:(10, 5)  b2:(1, 5)
    #   o:(tile_b, 5)
    x = x_ref[...]
    h = jnp.dot(x, w1t_ref[...], preferred_element_type=jnp.float32) + b1_ref[...]
    h = jnp.maximum(h, 0.0)                                        # ReLU
    y = jnp.dot(h, w2t_ref[...], preferred_element_type=jnp.float32) + b2_ref[...]
    o_ref[...] = y.astype(o_ref.dtype)


@functools.partial(jax.jit, static_argnames=("max_tile_b",))
def classifier_forward(x, w1, b1, w2, b2, *, max_tile_b=_MAX_TILE_B):
    """x: (B, 5).  w1: (10, 5), b1: (10,), w2: (5, 10), b2: (5,)
    (PyTorch nn.Linear weight layout: (out, in)).  Returns (B, 5) float32."""
    B = x.shape[0]

    x = x.astype(jnp.float32)
    # Tiny weight relayouts (<= 100 elements) so the kernel needs none.
    w1t = w1.astype(jnp.float32).T                    # (5, 10)
    w2t = w2.astype(jnp.float32).T                    # (10, 5)
    b1r = b1.astype(jnp.float32).reshape(1, HID_F)    # (1, 10) row bias
    b2r = b2.astype(jnp.float32).reshape(1, OUT_F)    # (1, 5)  row bias

    # Batch tile: as large as VMEM allows; second-minor block dim must be a
    # multiple of 8 (or the full extent).  Ragged last tile is fine.
    tile_b = min(max_tile_b, _round_up(B, 8))
    if B >= _MIN_SPLIT_B and pl.cdiv(B, tile_b) < 2:
        tile_b = _round_up(pl.cdiv(B, 2), 8)          # keep both v7x TCs busy
    num_tiles = pl.cdiv(B, tile_b)

    # VMEM budget: x + out blocks, each lane-padded to 128 lanes, double-buffered.
    block_vmem = _round_up(tile_b, 8) * 128 * 4       # bytes per (tile_b, <=128) f32 block
    vmem_limit = int(max(32 * 1024 * 1024, 4 * block_vmem + (8 << 20)))  # <= 40 MiB

    cost = pl.CostEstimate(
        flops=2 * B * (IN_F * HID_F + HID_F * OUT_F),
        transcendentals=0,
        bytes_accessed=4 * (B * (IN_F + OUT_F)
                            + IN_F * HID_F + HID_F + HID_F * OUT_F + OUT_F),
    )

    return pl.pallas_call(
        _mlp_kernel,
        out_shape=jax.ShapeDtypeStruct((B, OUT_F), jnp.float32),
        grid=(num_tiles,),
        in_specs=[
            pl.BlockSpec((tile_b, IN_F), lambda i: (i, 0)),    # streamed x tile
            pl.BlockSpec((IN_F, HID_F), lambda i: (0, 0)),     # invariant W1^T
            pl.BlockSpec((1, HID_F), lambda i: (0, 0)),        # invariant b1
            pl.BlockSpec((HID_F, OUT_F), lambda i: (0, 0)),    # invariant W2^T
            pl.BlockSpec((1, OUT_F), lambda i: (0, 0)),        # invariant b2
        ],
        out_specs=pl.BlockSpec((tile_b, OUT_F), lambda i: (i, 0)),
        compiler_params=pltpu.CompilerParams(
            dimension_semantics=("parallel",),                 # megacore-friendly
            vmem_limit_bytes=vmem_limit),
        cost_estimate=cost,
    )(x, w1t, b1r, w2t, b2r)


def _init_params(key):
    """Deterministic init mirroring nn.Linear's uniform(-1/sqrt(fan_in), ...)."""
    k1, k2, k3, k4 = jax.random.split(key, 4)
    bound1 = 1.0 / jnp.sqrt(5.0)
    bound2 = 1.0 / jnp.sqrt(10.0)
    w1 = jax.random.uniform(k1, (HID_F, IN_F), jnp.float32, -bound1, bound1)
    b1 = jax.random.uniform(k2, (HID_F,), jnp.float32, -bound1, bound1)
    w2 = jax.random.uniform(k3, (OUT_F, HID_F), jnp.float32, -bound2, bound2)
    b2 = jax.random.uniform(k4, (OUT_F,), jnp.float32, -bound2, bound2)
    return w1, b1, w2, b2


if __name__ == "__main__":
    key = jax.random.PRNGKey(0)
    kx, kp = jax.random.split(key)
    w1, b1, w2, b2 = _init_params(kp)

    # Small canonical case: batch=8, features=5.
    x = jax.random.normal(kx, (8, IN_F), jnp.float32)
    out = jax.block_until_ready(classifier_forward(x, w1, b1, w2, b2))
    ref = jnp.maximum(x @ w1.T + b1, 0.0) @ w2.T + b2
    assert out.shape == (8, OUT_F)
    assert jnp.allclose(out, ref, atol=1e-5, rtol=1e-5)

    # Ragged single-tile case (batch not a multiple of 8).
    x13 = jax.random.normal(kx, (13, IN_F), jnp.float32)
    out13 = jax.block_until_ready(classifier_forward(x13, w1, b1, w2, b2))
    ref13 = jnp.maximum(x13 @ w1.T + b1, 0.0) @ w2.T + b2
    assert out13.shape == (13, OUT_F)
    assert jnp.allclose(out13, ref13, atol=1e-5, rtol=1e-5)

    # Multi-tile grid with a ragged last tile (small max_tile_b to exercise
    # the pipelined grid path at small shapes).
    xb = jax.random.normal(kx, (1000, IN_F), jnp.float32)
    outb = jax.block_until_ready(
        classifier_forward(xb, w1, b1, w2, b2, max_tile_b=128))
    refb = jnp.maximum(xb @ w1.T + b1, 0.0) @ w2.T + b2
    assert outb.shape == (1000, OUT_F)
    assert jnp.allclose(outb, refb, atol=1e-5, rtol=1e-5)

    print("KERNEL_OK")
</pallas_src>

<mosaic_0001>
module attributes {stable_mosaic.version = 11 : i64} {
  func.func @_mlp_kernel(%arg0: i32, %arg1: memref<8x5xf32, #tpu.memory_space<vmem>>, %arg2: memref<5x10xf32, #tpu.memory_space<vmem>>, %arg3: memref<1x10xf32, #tpu.memory_space<vmem>>, %arg4: memref<10x5xf32, #tpu.memory_space<vmem>>, %arg5: memref<1x5xf32, #tpu.memory_space<vmem>>, %arg6: memref<8x5xf32, #tpu.memory_space<vmem>>) attributes {dimension_semantics = [#tpu.dimension_semantics<parallel>], iteration_bounds = array<i64: 1>, scalar_prefetch = 0 : i64, scratch_operands = 0 : i64, tpu.core_type = #tpu.core_type<tc>, window_params = [{transform_indices = @transform_0, window_bounds = array<i64: 8, 5>}, {pipeline_mode = #tpu.pipeline_mode<synchronous>, transform_indices = @transform_1, window_bounds = array<i64: 5, 10>}, {pipeline_mode = #tpu.pipeline_mode<synchronous>, transform_indices = @transform_2, window_bounds = array<i64: 1, 10>}, {pipeline_mode = #tpu.pipeline_mode<synchronous>, transform_indices = @transform_3, window_bounds = array<i64: 10, 5>}, {pipeline_mode = #tpu.pipeline_mode<synchronous>, transform_indices = @transform_4, window_bounds = array<i64: 1, 5>}, {transform_indices = @transform_5, window_bounds = array<i64: 8, 5>}]} {
    %c0 = arith.constant 0 : index
    %c0_0 = arith.constant 0 : index
    %0 = vector.load %arg1[%c0, %c0_0] : memref<8x5xf32, #tpu.memory_space<vmem>>, vector<8x5xf32>
    %c0_1 = arith.constant 0 : index
    %c0_2 = arith.constant 0 : index
    %1 = vector.load %arg2[%c0_1, %c0_2] : memref<5x10xf32, #tpu.memory_space<vmem>>, vector<5x10xf32>
    %cst = arith.constant dense<0.000000e+00> : vector<8x10xf32>
    %2 = tpu.matmul %0, %1, %cst {dimension_numbers = #tpu.dot_dimension_numbers<[1], [0], [0], [1], [0, 0, 1, 1], [], []>} : vector<8x5xf32>, vector<5x10xf32>, vector<8x10xf32> -> vector<8x10xf32>
    %c0_3 = arith.constant 0 : index
    %c0_4 = arith.constant 0 : index
    %3 = vector.load %arg3[%c0_3, %c0_4] : memref<1x10xf32, #tpu.memory_space<vmem>>, vector<1x10xf32>
    %4 = vector.broadcast %3 : vector<1x10xf32> to vector<8x10xf32>
    %5 = arith.addf %2, %4 : vector<8x10xf32>
    %cst_5 = arith.constant 0.000000e+00 : f32
    %6 = vector.broadcast %cst_5 : f32 to vector<8x10xf32>
    %7 = arith.maximumf %5, %6 : vector<8x10xf32>
    %c0_6 = arith.constant 0 : index
    %c0_7 = arith.constant 0 : index
    %8 = vector.load %arg4[%c0_6, %c0_7] : memref<10x5xf32, #tpu.memory_space<vmem>>, vector<10x5xf32>
    %cst_8 = arith.constant dense<0.000000e+00> : vector<8x5xf32>
    %9 = tpu.matmul %7, %8, %cst_8 {dimension_numbers = #tpu.dot_dimension_numbers<[1], [0], [0], [1], [0, 0, 1, 1], [], []>} : vector<8x10xf32>, vector<10x5xf32>, vector<8x5xf32> -> vector<8x5xf32>
    %c0_9 = arith.constant 0 : index
    %c0_10 = arith.constant 0 : index
    %10 = vector.load %arg5[%c0_9, %c0_10] : memref<1x5xf32, #tpu.memory_space<vmem>>, vector<1x5xf32>
    %11 = vector.broadcast %10 : vector<1x5xf32> to vector<8x5xf32>
    %12 = arith.addf %9, %11 : vector<8x5xf32>
    %c0_11 = arith.constant 0 : index
    %c0_12 = arith.constant 0 : index
    %13 = vector.load %arg6[%c0_11, %c0_12] : memref<8x5xf32, #tpu.memory_space<vmem>>, vector<8x5xf32>
    tpu.vector_store %arg6[%c0_11, %c0_12], %12 {strides = array<i32>} : memref<8x5xf32, #tpu.memory_space<vmem>>, vector<8x5xf32>,
    return
  }
  func.func @transform_0(%arg0: i32) -> (i32, i32) {
    %c0_i32 = arith.constant 0 : i32
    %c0_i32_0 = arith.constant 0 : i32
    return %arg0, %c0_i32 : i32, i32
  }
  func.func @transform_1(%arg0: i32) -> (i32, i32) {
    %c0_i32 = arith.constant 0 : i32
    %c0_i32_0 = arith.constant 0 : i32
    %c0_i32_1 = arith.constant 0 : i32
    return %c0_i32, %c0_i32_0 : i32, i32
  }
  func.func @transform_2(%arg0: i32) -> (i32, i32) {
    %c0_i32 = arith.constant 0 : i32
    %c0_i32_0 = arith.constant 0 : i32
    %c0_i32_1 = arith.constant 0 : i32
    return %c0_i32, %c0_i32_0 : i32, i32
  }
  func.func @transform_3(%arg0: i32) -> (i32, i32) {
    %c0_i32 = arith.constant 0 : i32
    %c0_i32_0 = arith.constant 0 : i32
    %c0_i32_1 = arith.constant 0 : i32
    return %c0_i32, %c0_i32_0 : i32, i32
  }
  func.func @transform_4(%arg0: i32) -> (i32, i32) {
    %c0_i32 = arith.constant 0 : i32
    %c0_i32_0 = arith.constant 0 : i32
    %c0_i32_1 = arith.constant 0 : i32
    return %c0_i32, %c0_i32_0 : i32, i32
  }
  func.func @transform_5(%arg0: i32) -> (i32, i32) {
    %c0_i32 = arith.constant 0 : i32
    %c0_i32_0 = arith.constant 0 : i32
    return %arg0, %c0_i32 : i32, i32
  }
}

</mosaic_0001>

<bundles_post_ra>
// kernel: classifier_forward.1
= control target key start
LH: loop header
LB: loop body
LE: loop exit
PB: predicated region body
PF: predicated region fallthrough
CT: control target
= control target key end

     0   :  { %vm34_vm0 = vcmask 1044480   ;;  %v259_v2 = vmov 0.0   ;;  %vm260_vm1 = vmmov 0   ;;  %vm30_vm2 = vcmask 39936   ;;  %s315_s0 = inlined_call_operand.vmem [shape: f32[8,5], index: 0, kind: input, shape index: {}]   ;;  %s316_s1 = inlined_call_operand.vmem [shape: f32[5,10], index: 1, kind: input, shape index: {}]   ;;  %s317_s2 = inlined_call_operand.vmem [shape: f32[1,10], index: 2, kind: input, shape index: {}]   ;;  %s318_s3 = inlined_call_operand.vmem [shape: f32[10,5], index: 3, kind: input, shape index: {}]   ;;  %s319_s4 = inlined_call_operand.vmem [shape: f32[1,5], index: 4, kind: input, shape index: {}]   ;;  %s320_s5 = inlined_call_operand.hbm [shape: f32[8,5], index: 5, kind: output, shape index: {}]  }
   0x1   :  { %v22_v0 = vld [vmem:[%s316_s1] sm:$0x1f]  ;;  %222 = vmatprep.subr.mxu0 %v259_v2  ;;  %224 = vmatprep.mubr.msk.f32.mxu0 %vm260_vm1, %v259_v2 }
   0x2   :  { %v21_v1 = vld [vmem:[%s315_s0] sm:$0xff] }
   0x3   :  { %10 = vsyncpa [#allocation3], 0  ;;  %223 = vmatpush3.msk.msra.mxu0 %vm34_vm0, %v22_v0  ;;  %227 = vmatprep.subr.mxu1 %v259_v2  ;;  %v110_v3 = vld [vmem:[%s318_s3 + $0x8] sm:$0x3]  ;;  %vm122_vm3 = vcmask 1041408   ;;  %v109_v4 = vld [vmem:[%s318_s3] sm:$0xff] }
   0x4   :  { %225 = vmatmul.mubr.msk.f32.vlgmr.msra.gmra.mxu0 %vm30_vm2, %v21_v1  ;;  %231 = vmatprep.mubr.msk.f32.mxu1 %vm260_vm1, %v259_v2  ;;  %v211_v5 = vld [vmem:[%s317_s2] ss:$0 sm:$0xff]  ;;  %vm118_vm4 = vcmask 80896   ;;  %s261_s28 = smov [#allocation2]  }
   0x5   :  { %228 = vmatpush3.msk.msra.mxu1 %vm122_vm3, %v110_v3  ;;  %v214_v10 = vld [vmem:[%s319_s4] ss:$0 sm:$0xff]  ;;  %s203_s29 = sshll.u32 %s261_s28, 4  ;;  %s204_s29 = int_to_ptr.vmem [resolvable:$true] %s203_s29 }
   0x6   :  { %229 = vmatprep.subr.mxu1 %v259_v2  ;;  %s237_s3 = scalar_lea.vmem %s204_s29, 128  ;;  %p242_p1 = scmp.lt.s32.totalorder %s204_s29, %s204_s29 }
   0x7   :  { %230 = vmatpush3.msra.mxu1 %v109_v4  ;;  %p238_p0 = scmp.ne.s32.totalorder %s204_s29, %s237_s3  ;;  %p243_p2 = scmp.lt.s32.totalorder %s237_s3, %s237_s3 }
   0x9   :  { %p244_p3 = por %p243_p2, %p242_p1 }
   0xb   :  { %p245_p4 = pnand %p244_p3, %p238_p0 }
  0xc4   :  { %v104_v6 = vpop.f32.mrf.mxu0 }
  0xc5   :  { %v105_v7 = vadd.f32 %v211_v5, %v104_v6 }
  0xc6   :  { %v226_v8 = vpop.f32.mrf.mxu0 }
  0xc7   :  { %v108_v9 = vmax.f32 %v105_v7, 0.0 }
  0xc9   :  { %232 = vmatmul.mubr.msk.f32.vlgmr.msra.gmra.mxu1 %vm118_vm4, %v108_v9 }
 0x189   :  { %v192_v11 = vpop.f32.mrf.mxu1 }
 0x18a   :  { %v193_v12 = vadd.f32 %v214_v10, %v192_v11 }
 0x18b   :  { %v233_v13 = vpop.f32.mrf.mxu1 }
 0x18c   :  { %196 = vst.msk [vmem:[#allocation2] sm:$0xff] %vm30_vm2, %v193_v12 }
 0x18d   :  { %248 = shalt.err (!%p245_p4)
}
 0x18e   :  { %206 = dma.vmem_to_hbm [thread:$0]  %s204_s29, 128, %s320_s5, [#allocation3]  }
 0x18f   :  { %257 = dma.done.wait [#allocation3], 128  }
 0x190   :  { %258 = vsyncadd [#allocation3], 4294967168 }
 0x191   :  { %210 = vsyncpa [#allocation3], 1 }

</bundles_post_ra>
